<compile_context>
chip_gen: v5e
topology: v5e:2x2
jax: 0.10.0
libtpu: 0.0.40
codegen_flags: <defaults>
</compile_context>

<pallas_src>
import jax
import jax.numpy as jnp
from jax import lax
from jax.experimental import pallas as pl
from jax.experimental.pallas import tpu as pltpu
import numpy as np


# ----------------------------------------------------------------------------- kernel
def _decoder_kernel(lhs_ref, w_ref, b_ref, o_ref):
    # lhs_ref: (B*H, 2*W*Cin)       bf16  im2col'd rows: [x[b,a] | x[b,a+1]] per row.
    # w_ref:   (2*W*Cin, 4*W*Cout)  bf16  block-Toeplitz ConvTranspose2d weights with
    #                                     the BatchNorm scale folded in.
    # b_ref:   (1, 4*W*Cout)        f32   folded BatchNorm bias, tiled per column.
    # o_ref:   (B*H, 4*W*Cout)      f32   lane-dense output slab; slab row (b,a)
    #                                     holds output rows (2a, 2a+1) back to back.
    y = jnp.dot(lhs_ref[...], w_ref[...], preferred_element_type=jnp.float32)
    o_ref[...] = jnp.maximum(y + b_ref[...], 0.0).astype(o_ref.dtype)


# ---------------------------------------------------------------------- weight folding
def _fold_bn(w_pt, gamma, beta, running_mean, running_var, eps, compute_dtype):
    """Fold eval-mode BatchNorm into the conv weights (scale) and a bias.

    The scaled weights are rounded to `compute_dtype` once so the kernel (which
    stores them in bf16) and the f32 reference see bit-identical values.
    """
    scale = gamma / jnp.sqrt(running_var + eps)                 # (Cout,)
    bias = (beta - running_mean * scale).astype(jnp.float32)    # (Cout,)
    w_scaled = w_pt * scale[None, :, None, None]                # (Cin, Cout, 3, 3)
    w_scaled = w_scaled.astype(compute_dtype).astype(jnp.float32)
    return w_scaled, bias


def _build_fused_weight(w_scaled, W):
    """Block-Toeplitz RHS for the stride-2 transposed conv (k=3, s=2, p=1, op=1).

    w_scaled: np.float32 (Cin, Cout, 3, 3) with the BN scale folded into Cout.
    Returns np.float32 (2*W*Cin, 2*2*W*Cout):
      row r = half*(W*Cin) + wi*Cin + ci    (half=0: input row a, half=1: row a+1)
      col c = py*(2*W*Cout) + ox*Cout + co  (ox = 2*w + px)
    so that  out[2a+py, ox, co] = sum_r lhs[a, r] * T[r, c]  with
    lhs[a] = [x[a] | x[a+1]] flattened (w-major, channel-minor).
    """
    Cin, Cout = w_scaled.shape[0], w_scaled.shape[1]
    T = np.zeros((2 * W * Cin, 2 * 2 * W * Cout), dtype=np.float32)
    # Output parity -> list of (input offset, kernel tap index); valid for
    # kernel_size=3, stride=2, padding=1, output_padding=1 only.
    row_taps = {0: [(0, 1)], 1: [(0, 2), (1, 0)]}   # (half, ky)
    col_taps = {0: [(0, 1)], 1: [(0, 2), (1, 0)]}   # (dw,   kx)
    for py, rtaps in row_taps.items():
        for px, ctaps in col_taps.items():
            for half, ky in rtaps:
                for dw, kx in ctaps:
                    tap = w_scaled[:, :, ky, kx]                 # (Cin, Cout)
                    for w in range(W):
                        wi = w + dw
                        if wi >= W:                              # right-edge zero pad
                            continue
                        r0 = half * (W * Cin) + wi * Cin
                        c0 = py * (2 * W * Cout) + (2 * w + px) * Cout
                        T[r0:r0 + Cin, c0:c0 + Cout] += tap
    return T


# --------------------------------------------------------------------------- wrapper
def light_decoder_forward(x_nchw, w_pt, gamma, beta, running_mean, running_var,
                          eps=1e-3, compute_dtype=jnp.bfloat16):
    """x_nchw: (B, Cin, H, W) f32; w_pt: (Cin, Cout, 3, 3) ConvTranspose2d weight.

    Returns NCHW output (B, Cout, 2H, 2W), matching LightDecoder.forward (eval mode).
    """
    B, Cin, H, W = x_nchw.shape
    # The fused Toeplitz weight below encodes ConvTranspose2d(kernel_size=3, stride=2,
    # padding=1, output_padding=1, bias=False) ONLY — fail loudly otherwise.
    assert w_pt.shape[0] == Cin and w_pt.shape[2:] == (3, 3), (
        "light_decoder_forward only supports ConvTranspose2d(k=3, s=2, p=1, op=1)")
    Cout = w_pt.shape[1]
    M = B * H                    # matmul rows: batch folded into M
    K = 2 * W * Cin              # contraction: [row a | row a+1] x (W, Cin)
    N = 2 * 2 * W * Cout         # output columns per slab row

    w_scaled, bias = _fold_bn(w_pt, gamma, beta, running_mean, running_var,
                              eps, compute_dtype)
    fused_w = jnp.asarray(
        _build_fused_weight(np.asarray(w_scaled, dtype=np.float32), W)
    ).astype(compute_dtype)                                     # (K, N) bf16
    bias_cols = jnp.tile(bias, 2 * 2 * W).reshape(1, N).astype(jnp.float32)

    # Wrapper-side im2col: NHWC rows flattened to (w, ci) lanes, one zero row of
    # bottom padding, then [row a | row a+1] concat and the bf16 cast — all cheap
    # XLA layout ops fused with the NCHW->NHWC transpose.  Kernel sees a ready LHS.
    x_rows = jnp.transpose(x_nchw, (0, 2, 3, 1)).reshape(B, H, W * Cin)
    x_rows = jnp.pad(x_rows, ((0, 0), (0, 1), (0, 0)))          # (B, H+1, W*Cin)
    lhs = jnp.concatenate([x_rows[:, 0:H, :], x_rows[:, 1:H + 1, :]], axis=-1)
    lhs = lhs.reshape(M, K).astype(compute_dtype)               # (B*H, 2*W*Cin) bf16

    cost = pl.CostEstimate(
        flops=2 * M * K * N,
        transcendentals=0,
        bytes_accessed=(lhs.size * lhs.dtype.itemsize
                        + fused_w.size * fused_w.dtype.itemsize
                        + bias_cols.size * bias_cols.dtype.itemsize
                        + M * N * 4),
    )

    out_slab = pl.pallas_call(
        _decoder_kernel,
        out_shape=jax.ShapeDtypeStruct((M, N), jnp.float32),
        # No grid: one kernel invocation, everything a single-buffered VMEM resident.
        in_specs=[
            pl.BlockSpec(memory_space=pltpu.MemorySpace.VMEM),   # lhs   (M, K)
            pl.BlockSpec(memory_space=pltpu.MemorySpace.VMEM),   # fused (K, N)
            pl.BlockSpec(memory_space=pltpu.MemorySpace.VMEM),   # bias  (1, N)
        ],
        out_specs=pl.BlockSpec(memory_space=pltpu.MemorySpace.VMEM),
        cost_estimate=cost,
    )(lhs, fused_w, bias_cols)

    # Slab row (b, a) = [output row 2a | output row 2a+1], each (2W, Cout) w-major:
    # one reshape recovers NHWC; the NCHW transpose is boundary glue.
    out_nhwc = out_slab.reshape(B, 2 * H, 2 * W, Cout)
    return jnp.transpose(out_nhwc, (0, 3, 1, 2))


# -------------------------------------------------------------------------- reference
def _reference(x_nchw, w_pt, gamma, beta, running_mean, running_var,
               eps=1e-3, compute_dtype=jnp.bfloat16):
    """Pure-JAX reference: ConvTranspose2d via dilated conv with flipped kernel,
    using the same folded/rounded weights as the kernel path."""
    w_scaled, bias = _fold_bn(w_pt, gamma, beta, running_mean, running_var,
                              eps, compute_dtype)
    x_nhwc = jnp.transpose(x_nchw, (0, 2, 3, 1))
    w_flip = w_scaled[:, :, ::-1, ::-1]
    w_hwio = jnp.transpose(w_flip, (2, 3, 0, 1))                # (kh, kw, Cin, Cout)
    conv = lax.conv_general_dilated(
        x_nhwc, w_hwio,
        window_strides=(1, 1),
        padding=((1, 2), (1, 2)),        # (k-1-p, k-1-p+output_padding)
        lhs_dilation=(2, 2),
        rhs_dilation=(1, 1),
        dimension_numbers=("NHWC", "HWIO", "NHWC"),
        precision=lax.Precision.HIGHEST,
    )
    y = jnp.maximum(conv + bias, 0.0)
    return jnp.transpose(y, (0, 3, 1, 2))


if __name__ == "__main__":
    key = jax.random.PRNGKey(0)
    B, H, W = 2, 16, 16
    Cin, Cout = 8, 4          # model_cfg: input_dim=8, output_dim=4
    eps = 1e-3

    k_x, k_w, k_g, k_b, k_m, k_v = jax.random.split(key, 6)

    # PyTorch-layout input (B, Cin, H, W); values pre-rounded to bf16 so the kernel
    # (bf16 MXU operands, f32 accumulation) and the f32 reference see identical inputs.
    x_nchw = jax.random.normal(k_x, (B, Cin, H, W), dtype=jnp.float32)
    x_nchw = x_nchw.astype(jnp.bfloat16).astype(jnp.float32)

    # ConvTranspose2d weight: (in_channels, out_channels, kH, kW), no bias.
    w_pt = (jax.random.normal(k_w, (Cin, Cout, 3, 3), dtype=jnp.float32)
            * (1.0 / np.sqrt(Cin * 9)))

    # BatchNorm2d(eps=1e-3) parameters / running stats (eval mode).
    gamma = 0.5 + jax.random.uniform(k_g, (Cout,), dtype=jnp.float32)
    beta = 0.1 * jax.random.normal(k_b, (Cout,), dtype=jnp.float32)
    running_mean = 0.1 * jax.random.normal(k_m, (Cout,), dtype=jnp.float32)
    running_var = 0.5 + jax.random.uniform(k_v, (Cout,), dtype=jnp.float32)

    out = light_decoder_forward(x_nchw, w_pt, gamma, beta, running_mean,
                                running_var, eps=eps)
    out = jax.block_until_ready(out)

    ref = _reference(x_nchw, w_pt, gamma, beta, running_mean, running_var, eps=eps)
    ref = jax.block_until_ready(ref)

    assert out.shape == (B, Cout, 2 * H, 2 * W), out.shape
    np.testing.assert_allclose(np.asarray(out), np.asarray(ref), rtol=1e-4, atol=1e-4)

    print("KERNEL_OK")
</pallas_src>

<mosaic_0001>
module attributes {stable_mosaic.version = 11 : i64} {
  func.func @_decoder_kernel(%arg0: memref<32x256xbf16, #tpu.memory_space<vmem>>, %arg1: memref<256x256xbf16, #tpu.memory_space<vmem>>, %arg2: memref<1x256xf32, #tpu.memory_space<vmem>>, %arg3: memref<32x256xf32, #tpu.memory_space<vmem>>) attributes {dimension_semantics = [], scalar_prefetch = 0 : i64, scratch_operands = 0 : i64, tpu.core_type = #tpu.core_type<tc>} {
    %c0 = arith.constant 0 : index
    %c0_0 = arith.constant 0 : index
    %0 = vector.load %arg0[%c0, %c0_0] : memref<32x256xbf16, #tpu.memory_space<vmem>>, vector<32x256xbf16>
    %c0_1 = arith.constant 0 : index
    %c0_2 = arith.constant 0 : index
    %1 = vector.load %arg1[%c0_1, %c0_2] : memref<256x256xbf16, #tpu.memory_space<vmem>>, vector<256x256xbf16>
    %cst = arith.constant dense<0.000000e+00> : vector<32x256xf32>
    %2 = tpu.matmul %0, %1, %cst {dimension_numbers = #tpu.dot_dimension_numbers<[1], [0], [0], [1], [0, 0, 1, 1], [], []>} : vector<32x256xbf16>, vector<256x256xbf16>, vector<32x256xf32> -> vector<32x256xf32>
    %c0_3 = arith.constant 0 : index
    %c0_4 = arith.constant 0 : index
    %3 = vector.load %arg2[%c0_3, %c0_4] : memref<1x256xf32, #tpu.memory_space<vmem>>, vector<1x256xf32>
    %4 = vector.broadcast %3 : vector<1x256xf32> to vector<32x256xf32>
    %5 = arith.addf %2, %4 : vector<32x256xf32>
    %cst_5 = arith.constant 0.000000e+00 : f32
    %6 = vector.broadcast %cst_5 : f32 to vector<32x256xf32>
    %7 = arith.maximumf %5, %6 : vector<32x256xf32>
    %c0_6 = arith.constant 0 : index
    %c0_7 = arith.constant 0 : index
    %8 = vector.load %arg3[%c0_6, %c0_7] : memref<32x256xf32, #tpu.memory_space<vmem>>, vector<32x256xf32>
    tpu.vector_store %arg3[%c0_6, %c0_7], %7 {strides = array<i32>} : memref<32x256xf32, #tpu.memory_space<vmem>>, vector<32x256xf32>,
    return
  }
}

</mosaic_0001>

<bundles_post_ra>
// kernel: tpu_custom_call.1
= control target key start
LH: loop header
LB: loop body
LE: loop exit
PB: predicated region body
PF: predicated region fallthrough
CT: control target
= control target key end

     0   :  { %8 = vsyncpa [#allocation3], 0  ;;  %s724_s0 = inlined_call_operand.hbm [shape: bf16[32,256], index: 0, kind: input, shape index: {}]   ;;  %s725_s1 = inlined_call_operand.hbm [shape: bf16[256,256], index: 1, kind: input, shape index: {}]   ;;  %s726_s2 = inlined_call_operand.hbm [shape: f32[1,256], index: 2, kind: input, shape index: {}]   ;;  %s727_s3 = inlined_call_operand.hbm [shape: f32[32,256], index: 3, kind: output, shape index: {}]  }
   0x1   :  { %9 = vsyncpa [#allocation6], 0 }
   0x2   :  { %10 = vsyncpa [#allocation4], 0  ;;  %s28_s14 = sshll.u32 %s725_s1, 4  ;;  %s684_s15 = smov [#allocation5]   ;;  %s29_s14 = int_to_ptr.hbm [resolvable:$true] %s28_s14 }
   0x3   :  { %s30_s16 = sshll.u32 %s684_s15, 4  ;;  %s15_s19 = sshll.u32 %s724_s0, 4  ;;  %s31_s16 = int_to_ptr.vmem [resolvable:$true] %s30_s16  ;;  %s16_s19 = int_to_ptr.hbm [resolvable:$true] %s15_s19 }
   0x4   :  { %s685_s20 = smov 128   ;;  %s686_s21 = smov 8  }
   0x5   :  { %36 = dma.hbm_to_vmem [thread:$0]  %s29_s14, 4096, %s31_s16, [#allocation6], %s685_s20, %s685_s20, %s686_s21  }
   0x6   :  { %s687_s22 = smov [#allocation2]   ;;  %s42_s26 = sshll.u32 %s726_s2, 4  ;;  %s43_s26 = int_to_ptr.hbm [resolvable:$true] %s42_s26 }
   0x7   :  { %s17_s23 = sshll.u32 %s687_s22, 4  ;;  %s688_s1 = smov [#allocation7]   ;;  %s18_s23 = int_to_ptr.vmem [resolvable:$true] %s17_s23 }
   0x8   :  { %23 = dma.hbm_to_vmem [thread:$0]  %s16_s19, 512, %s18_s23, [#allocation3], %s685_s20, %s685_s20, %s686_s21  }
   0x9   :  { %s44_s27 = sshll.u32 %s688_s1, 4  ;;  %s45_s27 = int_to_ptr.vmem [resolvable:$true] %s44_s27 }
   0xa   :  { %47 = dma.hbm_to_vmem [thread:$0]  %s43_s26, 32, %s45_s27, [#allocation6]  }
   0xb   :  { %678 = dma.done.wait [#allocation3], 512  }
   0xc   :  { %679 = vsyncadd [#allocation3], 4294966784 }
   0xd   :  { %680 = dma.done.wait [#allocation6], 4128  }
   0xe   :  { %681 = vsyncadd [#allocation6], 4294963168  ;;  %v468_v0 = vld [vmem:[#allocation5 + $0x70] sm:$0xf]  ;;  %v557_v1 = vld [vmem:[#allocation5 + $0x74] sm:$0xf0] }
   0xf   :  { %v532_v2 = vld [vmem:[#allocation5 + $0xf0] sm:$0xf]  ;;  %v469_v3 = vor.u32 %v557_v1, %v468_v0  ;;  %v573_v4 = vld [vmem:[#allocation5 + $0xf4] sm:$0xf0]  ;;  %v556_v5 = vld [vmem:[#allocation5 + $0x74] sm:$0xf] }
  0x10   :  { %v470_v6 = vld [vmem:[#allocation5 + $0x78] sm:$0xf0]  ;;  %v533_v7 = vor.u32 %v573_v4, %v532_v2  ;;  %v572_v9 = vld [vmem:[#allocation5 + $0xf4] sm:$0xf]  ;;  %v460_v11 = vld [vmem:[#allocation5 + $0x60] sm:$0xf] }
  0x11   :  { %v473_v8 = vor.u32 %v556_v5, %v470_v6  ;;  %v534_v10 = vld [vmem:[#allocation5 + $0xf8] sm:$0xf0]  ;;  %282 = vmatpush.bf16.msra.mxu0 %v469_v3  ;;  %v555_v13 = vld [vmem:[#allocation5 + $0x64] sm:$0xf0]  ;;  %v524_v14 = vld [vmem:[#allocation5 + $0xe0] sm:$0xf] }
  0x12   :  { %v537_v12 = vor.u32 %v572_v9, %v534_v10  ;;  %v571_v15 = vld [vmem:[#allocation5 + $0xe4] sm:$0xf0]  ;;  %301 = vmatpush.bf16.msra.mxu1 %v533_v7  ;;  %v461_v16 = vor.u32 %v555_v13, %v460_v11  ;;  %v554_v18 = vld [vmem:[#allocation5 + $0x64] sm:$0xf]  ;;  %v462_v19 = vld [vmem:[#allocation5 + $0x68] sm:$0xf0] }
  0x13   :  { %320 = vmatpush.bf16.msra.mxu2 %v473_v8  ;;  %v525_v17 = vor.u32 %v571_v15, %v524_v14  ;;  %v570_v20 = vld [vmem:[#allocation5 + $0xe4] sm:$0xf]  ;;  %v465_v21 = vor.u32 %v554_v18, %v462_v19  ;;  %v526_v22 = vld [vmem:[#allocation5 + $0xe8] sm:$0xf0]  ;;  %v452_v23 = vld [vmem:[#allocation5 + $0x50] sm:$0xf] }
  0x14   :  { %339 = vmatpush.bf16.msra.mxu3 %v537_v12  ;;  %v553_v24 = vld [vmem:[#allocation5 + $0x54] sm:$0xf0]  ;;  %v529_v25 = vor.u32 %v570_v20, %v526_v22  ;;  %v516_v26 = vld [vmem:[#allocation5 + $0xd0] sm:$0xf]  ;;  %v552_v28 = vld [vmem:[#allocation5 + $0x54] sm:$0xf] }
  0x15   :  { %v569_v27 = vld [vmem:[#allocation5 + $0xd4] sm:$0xf0]  ;;  %283 = vmatpush.bf16.msra.mxu0 %v461_v16  ;;  %v453_v29 = vor.u32 %v553_v24, %v452_v23  ;;  %v454_v30 = vld [vmem:[#allocation5 + $0x58] sm:$0xf0]  ;;  %v568_v31 = vld [vmem:[#allocation5 + $0xd4] sm:$0xf] }
  0x16   :  { %v518_v32 = vld [vmem:[#allocation5 + $0xd8] sm:$0xf0]  ;;  %302 = vmatpush.bf16.msra.mxu1 %v525_v17  ;;  %v517_v33 = vor.u32 %v569_v27, %v516_v26  ;;  %v457_v34 = vor.u32 %v552_v28, %v454_v30  ;;  %v444_v35 = vld [vmem:[#allocation5 + $0x40] sm:$0xf]  ;;  %v551_v36 = vld [vmem:[#allocation5 + $0x44] sm:$0xf0] }
  0x17   :  { %321 = vmatpush.bf16.msra.mxu2 %v465_v21  ;;  %v508_v37 = vld [vmem:[#allocation5 + $0xc0] sm:$0xf]  ;;  %v521_v38 = vor.u32 %v568_v31, %v518_v32  ;;  %v567_v39 = vld [vmem:[#allocation5 + $0xc4] sm:$0xf0]  ;;  %v550_v40 = vld [vmem:[#allocation5 + $0x44] sm:$0xf]  ;;  %v445_v44 = vor.u32 %v551_v36, %v444_v35 }
  0x18   :  { %340 = vmatpush.bf16.msra.mxu3 %v529_v25  ;;  %v446_v41 = vld [vmem:[#allocation5 + $0x48] sm:$0xf0]  ;;  %v566_v42 = vld [vmem:[#allocation5 + $0xc4] sm:$0xf]  ;;  %v509_v45 = vor.u32 %v567_v39, %v508_v37  ;;  %v436_v47 = vld [vmem:[#allocation5 + $0x30] sm:$0xf] }
  0x19   :  { %v510_v43 = vld [vmem:[#allocation5 + $0xc8] sm:$0xf0]  ;;  %284 = vmatpush.bf16.msra.mxu0 %v453_v29  ;;  %v449_v46 = vor.u32 %v550_v40, %v446_v41  ;;  %v549_v48 = vld [vmem:[#allocation5 + $0x34] sm:$0xf0]  ;;  %v500_v49 = vld [vmem:[#allocation5 + $0xb0] sm:$0xf] }
  0x1a   :  { %303 = vmatpush.bf16.msra.mxu1 %v517_v33  ;;  %v513_v50 = vor.u32 %v566_v42, %v510_v43  ;;  %v565_v51 = vld [vmem:[#allocation5 + $0xb4] sm:$0xf0]  ;;  %v548_v52 = vld [vmem:[#allocation5 + $0x34] sm:$0xf]  ;;  %v438_v53 = vld [vmem:[#allocation5 + $0x38] sm:$0xf0]  ;;  %v437_v56 = vor.u32 %v549_v48, %v436_v47 }
  0x1b   :  { %322 = vmatpush.bf16.msra.mxu2 %v457_v34  ;;  %v564_v54 = vld [vmem:[#allocation5 + $0xb4] sm:$0xf]  ;;  %v502_v55 = vld [vmem:[#allocation5 + $0xb8] sm:$0xf0]  ;;  %v501_v57 = vor.u32 %v565_v51, %v500_v49  ;;  %v441_v58 = vor.u32 %v548_v52, %v438_v53  ;;  %v428_v59 = vld [vmem:[#allocation5 + $0x20] sm:$0xf] }
  0x1c   :  { %341 = vmatpush.bf16.msra.mxu3 %v521_v38  ;;  %v547_v60 = vld [vmem:[#allocation5 + $0x24] sm:$0xf0]  ;;  %v492_v61 = vld [vmem:[#allocation5 + $0xa0] sm:$0xf]  ;;  %v505_v62 = vor.u32 %v564_v54, %v502_v55  ;;  %v546_v0 = vld [vmem:[#allocation5 + $0x24] sm:$0xf] }
  0x1d   :  { %285 = vmatpush.bf16.msra.mxu0 %v445_v44  ;;  %v563_v63 = vld [vmem:[#allocation5 + $0xa4] sm:$0xf0]  ;;  %v430_v1 = vld [vmem:[#allocation5 + $0x28] sm:$0xf0]  ;;  %v562_v2 = vld [vmem:[#allocation5 + $0xa4] sm:$0xf]  ;;  %v429_v4 = vor.u32 %v547_v60, %v428_v59 }
  0x1e   :  { %304 = vmatpush.bf16.msra.mxu1 %v509_v45  ;;  %v494_v3 = vld [vmem:[#allocation5 + $0xa8] sm:$0xf0]  ;;  %v493_v5 = vor.u32 %v563_v63, %v492_v61  ;;  %v433_v6 = vor.u32 %v546_v0, %v430_v1  ;;  %v420_v7 = vld [vmem:[#allocation5 + $0x10] sm:$0xf]  ;;  %v545_v8 = vld [vmem:[#allocation5 + $0x14] sm:$0xf0] }
  0x1f   :  { %323 = vmatpush.bf16.msra.mxu2 %v449_v46  ;;  %v484_v9 = vld [vmem:[#allocation5 + $0x90] sm:$0xf]  ;;  %v497_v10 = vor.u32 %v562_v2, %v494_v3  ;;  %v561_v11 = vld [vmem:[#allocation5 + $0x94] sm:$0xf0]  ;;  %v544_v12 = vld [vmem:[#allocation5 + $0x14] sm:$0xf]  ;;  %v421_v16 = vor.u32 %v545_v8, %v420_v7 }
  0x20   :  { %342 = vmatpush.bf16.msra.mxu3 %v513_v50  ;;  %v422_v13 = vld [vmem:[#allocation5 + $0x18] sm:$0xf0]  ;;  %v560_v14 = vld [vmem:[#allocation5 + $0x94] sm:$0xf]  ;;  %v485_v17 = vor.u32 %v561_v11, %v484_v9  ;;  %v412_v19 = vld [vmem:[#allocation5] sm:$0xf] }
  0x21   :  { %286 = vmatpush.bf16.msra.mxu0 %v437_v56  ;;  %v486_v15 = vld [vmem:[#allocation5 + $0x98] sm:$0xf0]  ;;  %v425_v18 = vor.u32 %v544_v12, %v422_v13  ;;  %v543_v20 = vld [vmem:[#allocation5 + $0x4] sm:$0xf0]  ;;  %v476_v21 = vld [vmem:[#allocation5 + $0x80] sm:$0xf] }
  0x22   :  { %305 = vmatpush.bf16.msra.mxu1 %v501_v57  ;;  %v489_v22 = vor.u32 %v560_v14, %v486_v15  ;;  %v559_v23 = vld [vmem:[#allocation5 + $0x84] sm:$0xf0]  ;;  %v542_v24 = vld [vmem:[#allocation5 + $0x4] sm:$0xf]  ;;  %v414_v25 = vld [vmem:[#allocation5 + $0x8] sm:$0xf0]  ;;  %v413_v28 = vor.u32 %v543_v20, %v412_v19 }
  0x23   :  { %324 = vmatpush.bf16.msra.mxu2 %v441_v58  ;;  %v558_v26 = vld [vmem:[#allocation5 + $0x84] sm:$0xf]  ;;  %v478_v27 = vld [vmem:[#allocation5 + $0x88] sm:$0xf0]  ;;  %v396_v29 = vld [vmem:[#allocation2] sm:$0xf]  ;;  %v477_v31 = vor.u32 %v559_v23, %v476_v21  ;;  %v417_v32 = vor.u32 %v542_v24, %v414_v25 }
  0x24   :  { %343 = vmatpush.bf16.msra.mxu3 %v505_v62  ;;  %v539_v30 = vld [vmem:[#allocation2 + $0x4] sm:$0xf0]  ;;  %v538_v33 = vld [vmem:[#allocation2 + $0x4] sm:$0xf]  ;;  %v398_v34 = vld [vmem:[#allocation2 + $0x8] sm:$0xf0]  ;;  %v481_v35 = vor.u32 %v558_v26, %v478_v27 }
  0x25   :  { %287 = vmatpush.bf16.msra.mxu0 %v429_v4  ;;  %v397_v36 = vor.u32 %v539_v30, %v396_v29  ;;  %v401_v37 = vor.u32 %v538_v33, %v398_v34  ;;  %v404_v38 = vld [vmem:[#allocation2 + $0x10] sm:$0xf]  ;;  %v541_v39 = vld [vmem:[#allocation2 + $0x14] sm:$0xf0]  ;;  %v540_v40 = vld [vmem:[#allocation2 + $0x14] sm:$0xf] }
  0x26   :  { %306 = vmatpush.bf16.msra.mxu1 %v493_v5  ;;  %v406_v41 = vld [vmem:[#allocation2 + $0x18] sm:$0xf0]  ;;  %v405_v42 = vor.u32 %v541_v39, %v404_v38  ;;  %v96_v44 = vld [vmem:[#allocation7] sm:$0x3]  ;;  %s689_s0 = smov [#allocation8]   ;;  %s380_s30 = sshll.u32 %s727_s3, 4  ;;  %s381_s30 = int_to_ptr.hbm [resolvable:$true] %s380_s30 }
  0x27   :  { %325 = vmatpush.bf16.msra.mxu2 %v433_v6  ;;  %v409_v43 = vor.u32 %v540_v40, %v406_v41  ;;  %v98_v45 = vperm.slane %v96_v44, 0  ;;  %v99_v50 = vperm.slane %v96_v44, 1  ;;  %s378_s2 = sshll.u32 %s689_s0, 4  ;;  %s690_s4 = smov 256   ;;  %s379_s2 = int_to_ptr.vmem [resolvable:$true] %s378_s2 }
  0x28   :  { %344 = vmatpush.bf16.msra.mxu3 %v497_v10  ;;  %s691_s5 = smov 16  }
  0x29   :  { %288 = vmatpush.bf16.msra.mxu0 %v421_v16 }
  0x2a   :  { %307 = vmatpush.bf16.msra.mxu1 %v485_v17 }
  0x2b   :  { %326 = vmatpush.bf16.msra.mxu2 %v425_v18 }
  0x2c   :  { %345 = vmatpush.bf16.msra.mxu3 %v489_v22 }
  0x2d   :  { %289 = vmatpush.bf16.msra.mxu0 %v413_v28 }
  0x2e   :  { %308 = vmatpush.bf16.msra.mxu1 %v477_v31 }
  0x2f   :  { %327 = vmatpush.bf16.msra.mxu2 %v417_v32 }
  0x30   :  { %346 = vmatpush.bf16.msra.mxu3 %v481_v35  ;;  %290 = vmatmul.bf16.vlgmr.msra.gmra.mxu0 %v397_v36 }
  0x31   :  { %309 = vmatmul.bf16.vlgmr.msra.gmra.mxu1 %v401_v37 }
  0x32   :  { %328 = vmatmul.bf16.vlgmr.msra.gmra.mxu2 %v397_v36 }
  0x33   :  { %347 = vmatmul.bf16.vlgmr.msra.gmra.mxu3 %v401_v37 }
  0x40   :  { %295 = vmatmul.bf16.gmra.mxu0 %v405_v42 }
  0x41   :  { %314 = vmatmul.bf16.gmra.mxu1 %v409_v43 }
  0x42   :  { %333 = vmatmul.bf16.gmra.mxu2 %v405_v42 }
  0x43   :  { %352 = vmatmul.bf16.gmra.mxu3 %v409_v43 }
  0xad   :  { %v291_v46 = vpop.f32.mrf.mxu0 }
  0xae   :  { %v292_v47 = vadd.f32 %v291_v46, %v98_v45  ;;  %v310_v48 = vpop.f32.mrf.mxu1 }
  0xb0   :  { %v311_v49 = vadd.f32 %v310_v48, %v292_v47 }
  0xb2   :  { %v358_v51 = vmax.f32 %v311_v49, 0.0 }
  0xb4   :  { %366 = vst [vmem:[#allocation8] sm:$0xff] %v358_v51 }
  0xb5   :  { %v329_v52 = vpop.f32.mrf.mxu2  ;;  %v293_v55 = vpop.f32.mrf.mxu0 }
  0xb6   :  { %v330_v53 = vadd.f32 %v329_v52, %v99_v50  ;;  %v348_v54 = vpop.f32.mrf.mxu3  ;;  %v294_v56 = vadd.f32 %v293_v55, %v98_v45  ;;  %v312_v57 = vpop.f32.mrf.mxu1 }
  0xb8   :  { %v349_v58 = vadd.f32 %v348_v54, %v330_v53  ;;  %v313_v59 = vadd.f32 %v312_v57, %v294_v56 }
  0xba   :  { %v359_v60 = vmax.f32 %v349_v58, 0.0  ;;  %v360_v61 = vmax.f32 %v313_v59, 0.0 }
  0xbc   :  { %367 = vst [vmem:[#allocation8 + $0x8] sm:$0xff] %v359_v60 }
  0xbd   :  { %368 = vst [vmem:[#allocation8 + $0x10] sm:$0xff] %v360_v61  ;;  %v331_v62 = vpop.f32.mrf.mxu2  ;;  %v296_v1 = vpop.f32.mrf.mxu0 }
  0xbe   :  { %v332_v63 = vadd.f32 %v331_v62, %v99_v50  ;;  %v350_v0 = vpop.f32.mrf.mxu3  ;;  %v297_v2 = vadd.f32 %v296_v1, %v98_v45  ;;  %v315_v3 = vpop.f32.mrf.mxu1 }
  0xc0   :  { %v351_v4 = vadd.f32 %v350_v0, %v332_v63  ;;  %v316_v5 = vadd.f32 %v315_v3, %v297_v2 }
  0xc2   :  { %v361_v6 = vmax.f32 %v351_v4, 0.0  ;;  %v362_v7 = vmax.f32 %v316_v5, 0.0 }
  0xc4   :  { %369 = vst [vmem:[#allocation8 + $0x18] sm:$0xff] %v361_v6 }
  0xc5   :  { %370 = vst [vmem:[#allocation8 + $0x20] sm:$0xff] %v362_v7  ;;  %v334_v8 = vpop.f32.mrf.mxu2  ;;  %v298_v11 = vpop.f32.mrf.mxu0 }
  0xc6   :  { %v335_v9 = vadd.f32 %v334_v8, %v99_v50  ;;  %v353_v10 = vpop.f32.mrf.mxu3  ;;  %v299_v12 = vadd.f32 %v298_v11, %v98_v45  ;;  %v317_v14 = vpop.f32.mrf.mxu1 }
  0xc8   :  { %v354_v13 = vadd.f32 %v353_v10, %v335_v9  ;;  %v318_v15 = vadd.f32 %v317_v14, %v299_v12 }
  0xca   :  { %v363_v16 = vmax.f32 %v354_v13, 0.0  ;;  %v364_v17 = vmax.f32 %v318_v15, 0.0 }
  0xcc   :  { %371 = vst [vmem:[#allocation8 + $0x28] sm:$0xff] %v363_v16 }
  0xcd   :  { %372 = vst [vmem:[#allocation8 + $0x30] sm:$0xff] %v364_v17  ;;  %v336_v18 = vpop.f32.mrf.mxu2 }
  0xce   :  { %v337_v19 = vadd.f32 %v336_v18, %v99_v50  ;;  %v355_v20 = vpop.f32.mrf.mxu3 }
  0xd0   :  { %v356_v21 = vadd.f32 %v355_v20, %v337_v19 }
  0xd2   :  { %v365_v22 = vmax.f32 %v356_v21, 0.0 }
  0xd4   :  { %373 = vst [vmem:[#allocation8 + $0x38] sm:$0xff] %v365_v22 }
  0xd5   :  { %386 = dma.vmem_to_hbm [thread:$0]  %s379_s2, 1024, %s381_s30, [#allocation4], %s690_s4, %s690_s4, %s691_s5  }
  0xd6   :  { %682 = dma.done.wait [#allocation4], 1024  }
  0xd7   :  { %683 = vsyncadd [#allocation4], 4294966272 }
  0xd8   :  { %391 = vsyncpa [#allocation3], 1 }
  0xd9   :  { %392 = vsyncpa [#allocation6], 1 }
  0xda   :  { %393 = vsyncpa [#allocation4], 1 }

</bundles_post_ra>
